<compile_context>
chip_gen: v5e
topology: v5e:2x2
jax: 0.10.0
libtpu: 0.0.40
codegen_flags: <defaults>
</compile_context>

<pallas_src>
import functools

import jax
import jax.numpy as jnp
from jax.experimental import pallas as pl
from jax.experimental.pallas import tpu as pltpu


def _round_up(n, m):
    return ((n + m - 1) // m) * m


def _mlp_kernel(xt_ref, w1_ref, b1_ref, w2_ref, b2_ref, w3_ref, b3_ref, ot_ref):
    """Full forward pass for one batch tile (batch on the lane axis).

    xt_ref : (din,  bt)  compute dtype (bf16)
    wN_ref : (out,  in)  compute dtype (PyTorch layout)
    bN_ref : (out,  1 )  float32
    ot_ref : (dout, bt)  float32
    """
    xt = xt_ref[...]

    h1 = jnp.dot(w1_ref[...], xt, preferred_element_type=jnp.float32) + b1_ref[...]
    h1 = jnp.maximum(h1, 0.0)  # ReLU (f32, lane-dense)

    h2 = jnp.dot(w2_ref[...], h1.astype(w2_ref.dtype),
                 preferred_element_type=jnp.float32) + b2_ref[...]
    h2 = jnp.maximum(h2, 0.0)  # ReLU

    logits_t = jnp.dot(w3_ref[...], h2.astype(w3_ref.dtype),
                       preferred_element_type=jnp.float32) + b3_ref[...]
    ot_ref[...] = logits_t.astype(ot_ref.dtype)


@functools.partial(jax.jit, static_argnames=("batch_tile", "compute_dtype"))
def as_classifier_forward(x, params, *, batch_tile=512, compute_dtype=jnp.bfloat16):
    """Pallas forward pass for ASClassifier.

    x: (B, input_dim) float32
    params: dict with w1,b1,w2,b2,w3,b3 in PyTorch layout
            (wN: (out, in), bN: (out, 1)).
    """
    w1, b1, w2, b2, w3, b3 = (params[k] for k in ("w1", "b1", "w2", "b2", "w3", "b3"))
    B, din = x.shape
    hidden = w1.shape[0]
    dout = w3.shape[0]

    # Batch sits on the lane axis, so the tile must be a multiple of 128.
    # Clamp for tiny batches so we don't over-pad, then pad B up to a whole
    # number of tiles (padded columns are computed but sliced away — output
    # writes for real rows are unaffected).
    bt = _round_up(min(batch_tile, _round_up(B, 128)), 128)
    B_pad = _round_up(B, bt)
    grid = (B_pad // bt,)

    # One-time casts outside the kernel: bf16 streaming input + weights,
    # f32 biases (accumulation / bias add / ReLU stay f32 inside the kernel).
    xt = x.T.astype(compute_dtype)
    if B_pad != B:
        xt = jnp.pad(xt, ((0, 0), (0, B_pad - B)))
    w1c, w2c, w3c = (w.astype(compute_dtype) for w in (w1, w2, w3))
    b1f, b2f, b3f = (b.astype(jnp.float32) for b in (b1, b2, b3))

    rep = lambda i: (0, 0)  # weights/biases: same (tiny) block every step
    in_specs = [
        # x^T tile: full feature dim on sublanes, batch_tile lanes.
        # TODO(synk): if the x DMA is still exposed in traces, add
        # pipeline_mode=pl.Buffered(3) here.
        pl.BlockSpec((din, bt), lambda i: (0, i)),
        pl.BlockSpec(w1c.shape, rep),
        pl.BlockSpec(b1f.shape, rep),
        pl.BlockSpec(w2c.shape, rep),
        pl.BlockSpec(b2f.shape, rep),
        pl.BlockSpec(w3c.shape, rep),
        pl.BlockSpec(b3f.shape, rep),
    ]
    out_spec = pl.BlockSpec((dout, bt), lambda i: (0, i))

    itemsize = jnp.dtype(compute_dtype).itemsize
    flops = 2 * B_pad * (din * hidden + hidden * hidden + hidden * dout)
    bytes_accessed = (
        din * B_pad * itemsize                                    # x^T in
        + (w1c.size + w2c.size + w3c.size) * itemsize             # weights
        + (b1f.size + b2f.size + b3f.size) * 4                    # biases
        + dout * B_pad * 4                                        # logits^T out
    )
    cost = pl.CostEstimate(flops=flops, transcendentals=0,
                           bytes_accessed=bytes_accessed)

    logits_t = pl.pallas_call(
        _mlp_kernel,
        out_shape=jax.ShapeDtypeStruct((dout, B_pad), jnp.float32),
        grid=grid,
        in_specs=in_specs,
        out_specs=out_spec,
        compiler_params=pltpu.CompilerParams(
            dimension_semantics=("parallel",)
        ),
        cost_estimate=cost,
    )(xt, w1c, b1f, w2c, b2f, w3c, b3f)

    # Back to batch-major, drop padding. Logits stay f32.
    return logits_t.T[:B]


def init_params(key, input_dim, output_dim):
    """nn.Linear default init U(-1/sqrt(fan_in), 1/sqrt(fan_in)), PyTorch layout."""
    hidden = round((input_dim + output_dim) * 0.66)

    def linear(key, fan_in, fan_out):
        kw, kb = jax.random.split(key)
        bound = 1.0 / float(fan_in) ** 0.5
        w = jax.random.uniform(kw, (fan_out, fan_in), jnp.float32, -bound, bound)
        b = jax.random.uniform(kb, (fan_out, 1), jnp.float32, -bound, bound)
        return w, b

    k1, k2, k3 = jax.random.split(key, 3)
    w1, b1 = linear(k1, input_dim, hidden)
    w2, b2 = linear(k2, hidden, hidden)
    w3, b3 = linear(k3, hidden, output_dim)
    return {"w1": w1, "b1": b1, "w2": w2, "b2": b2, "w3": w3, "b3": b3}


def _reference_forward(x, params, compute_dtype=jnp.bfloat16):
    """Pure-JAX reference with the same bf16-in / f32-accumulate precision."""
    cd = compute_dtype

    def lin(a, w, b):
        return jnp.dot(a.astype(cd), w.astype(cd).T,
                       preferred_element_type=jnp.float32) + b.reshape(1, -1)

    h = jnp.maximum(lin(x, params["w1"], params["b1"]), 0.0)
    h = jnp.maximum(lin(h, params["w2"], params["b2"]), 0.0)
    return lin(h, params["w3"], params["b3"])


if __name__ == "__main__":
    key = jax.random.PRNGKey(0)
    k_params, k_x = jax.random.split(key)

    # hidden = round((32 + 10) * 0.66) = 28
    batch, input_dim, output_dim = 512, 32, 10
    params = init_params(k_params, input_dim, output_dim)
    x = jax.random.normal(k_x, (batch, input_dim), jnp.float32)

    # batch_tile=256 -> 2 lane-dense grid steps (keeps both v7x TCs busy).
    logits = as_classifier_forward(x, params, batch_tile=256)
    logits = jax.block_until_ready(logits)

    ref = _reference_forward(x, params)
    assert logits.shape == (batch, output_dim)
    assert jnp.allclose(logits, ref, atol=1e-3, rtol=1e-3), float(
        jnp.max(jnp.abs(logits - ref))
    )

    print("KERNEL_OK")
</pallas_src>

<mosaic_0001>
module attributes {stable_mosaic.version = 11 : i64} {
  func.func @_mlp_kernel(%arg0: i32, %arg1: memref<32x256xbf16, #tpu.memory_space<vmem>>, %arg2: memref<28x32xbf16, #tpu.memory_space<vmem>>, %arg3: memref<28x1xf32, #tpu.memory_space<vmem>>, %arg4: memref<28x28xbf16, #tpu.memory_space<vmem>>, %arg5: memref<28x1xf32, #tpu.memory_space<vmem>>, %arg6: memref<10x28xbf16, #tpu.memory_space<vmem>>, %arg7: memref<10x1xf32, #tpu.memory_space<vmem>>, %arg8: memref<10x256xf32, #tpu.memory_space<vmem>>) attributes {dimension_semantics = [#tpu.dimension_semantics<parallel>], iteration_bounds = array<i64: 2>, scalar_prefetch = 0 : i64, scratch_operands = 0 : i64, tpu.core_type = #tpu.core_type<tc>, window_params = [{transform_indices = @transform_0, window_bounds = array<i64: 32, 256>}, {pipeline_mode = #tpu.pipeline_mode<synchronous>, transform_indices = @transform_1, window_bounds = array<i64: 28, 32>}, {pipeline_mode = #tpu.pipeline_mode<synchronous>, transform_indices = @transform_2, window_bounds = array<i64: 28, 1>}, {pipeline_mode = #tpu.pipeline_mode<synchronous>, transform_indices = @transform_3, window_bounds = array<i64: 28, 28>}, {pipeline_mode = #tpu.pipeline_mode<synchronous>, transform_indices = @transform_4, window_bounds = array<i64: 28, 1>}, {pipeline_mode = #tpu.pipeline_mode<synchronous>, transform_indices = @transform_5, window_bounds = array<i64: 10, 28>}, {pipeline_mode = #tpu.pipeline_mode<synchronous>, transform_indices = @transform_6, window_bounds = array<i64: 10, 1>}, {transform_indices = @transform_7, window_bounds = array<i64: 10, 256>}]} {
    %c0 = arith.constant 0 : index
    %c0_0 = arith.constant 0 : index
    %0 = vector.load %arg1[%c0, %c0_0] : memref<32x256xbf16, #tpu.memory_space<vmem>>, vector<32x256xbf16>
    %c0_1 = arith.constant 0 : index
    %c0_2 = arith.constant 0 : index
    %1 = vector.load %arg2[%c0_1, %c0_2] : memref<28x32xbf16, #tpu.memory_space<vmem>>, vector<28x32xbf16>
    %cst = arith.constant dense<0.000000e+00> : vector<28x256xf32>
    %2 = tpu.matmul %1, %0, %cst {dimension_numbers = #tpu.dot_dimension_numbers<[1], [0], [0], [1], [0, 0, 1, 1], [], []>} : vector<28x32xbf16>, vector<32x256xbf16>, vector<28x256xf32> -> vector<28x256xf32>
    %c0_3 = arith.constant 0 : index
    %c0_4 = arith.constant 0 : index
    %3 = vector.load %arg3[%c0_3, %c0_4] : memref<28x1xf32, #tpu.memory_space<vmem>>, vector<28x1xf32>
    %4 = vector.broadcast %3 : vector<28x1xf32> to vector<28x256xf32>
    %5 = arith.addf %2, %4 : vector<28x256xf32>
    %cst_5 = arith.constant 0.000000e+00 : f32
    %6 = vector.broadcast %cst_5 : f32 to vector<28x256xf32>
    %7 = arith.maximumf %5, %6 : vector<28x256xf32>
    %c0_6 = arith.constant 0 : index
    %c0_7 = arith.constant 0 : index
    %8 = vector.load %arg4[%c0_6, %c0_7] : memref<28x28xbf16, #tpu.memory_space<vmem>>, vector<28x28xbf16>
    %9 = arith.truncf %7 : vector<28x256xf32> to vector<28x256xbf16>
    %cst_8 = arith.constant dense<0.000000e+00> : vector<28x256xf32>
    %10 = tpu.matmul %8, %9, %cst_8 {dimension_numbers = #tpu.dot_dimension_numbers<[1], [0], [0], [1], [0, 0, 1, 1], [], []>} : vector<28x28xbf16>, vector<28x256xbf16>, vector<28x256xf32> -> vector<28x256xf32>
    %c0_9 = arith.constant 0 : index
    %c0_10 = arith.constant 0 : index
    %11 = vector.load %arg5[%c0_9, %c0_10] : memref<28x1xf32, #tpu.memory_space<vmem>>, vector<28x1xf32>
    %12 = vector.broadcast %11 : vector<28x1xf32> to vector<28x256xf32>
    %13 = arith.addf %10, %12 : vector<28x256xf32>
    %cst_11 = arith.constant 0.000000e+00 : f32
    %14 = vector.broadcast %cst_11 : f32 to vector<28x256xf32>
    %15 = arith.maximumf %13, %14 : vector<28x256xf32>
    %c0_12 = arith.constant 0 : index
    %c0_13 = arith.constant 0 : index
    %16 = vector.load %arg6[%c0_12, %c0_13] : memref<10x28xbf16, #tpu.memory_space<vmem>>, vector<10x28xbf16>
    %17 = arith.truncf %15 : vector<28x256xf32> to vector<28x256xbf16>
    %cst_14 = arith.constant dense<0.000000e+00> : vector<10x256xf32>
    %18 = tpu.matmul %16, %17, %cst_14 {dimension_numbers = #tpu.dot_dimension_numbers<[1], [0], [0], [1], [0, 0, 1, 1], [], []>} : vector<10x28xbf16>, vector<28x256xbf16>, vector<10x256xf32> -> vector<10x256xf32>
    %c0_15 = arith.constant 0 : index
    %c0_16 = arith.constant 0 : index
    %19 = vector.load %arg7[%c0_15, %c0_16] : memref<10x1xf32, #tpu.memory_space<vmem>>, vector<10x1xf32>
    %20 = vector.broadcast %19 : vector<10x1xf32> to vector<10x256xf32>
    %21 = arith.addf %18, %20 : vector<10x256xf32>
    %c0_17 = arith.constant 0 : index
    %c0_18 = arith.constant 0 : index
    %22 = vector.load %arg8[%c0_17, %c0_18] : memref<10x256xf32, #tpu.memory_space<vmem>>, vector<10x256xf32>
    tpu.vector_store %arg8[%c0_17, %c0_18], %21 {strides = array<i32>} : memref<10x256xf32, #tpu.memory_space<vmem>>, vector<10x256xf32>,
    return
  }
  func.func @transform_0(%arg0: i32) -> (i32, i32) {
    %c0_i32 = arith.constant 0 : i32
    %c0_i32_0 = arith.constant 0 : i32
    return %c0_i32, %arg0 : i32, i32
  }
  func.func @transform_1(%arg0: i32) -> (i32, i32) {
    %c0_i32 = arith.constant 0 : i32
    %c0_i32_0 = arith.constant 0 : i32
    %c0_i32_1 = arith.constant 0 : i32
    return %c0_i32, %c0_i32_0 : i32, i32
  }
  func.func @transform_2(%arg0: i32) -> (i32, i32) {
    %c0_i32 = arith.constant 0 : i32
    %c0_i32_0 = arith.constant 0 : i32
    %c0_i32_1 = arith.constant 0 : i32
    return %c0_i32, %c0_i32_0 : i32, i32
  }
  func.func @transform_3(%arg0: i32) -> (i32, i32) {
    %c0_i32 = arith.constant 0 : i32
    %c0_i32_0 = arith.constant 0 : i32
    %c0_i32_1 = arith.constant 0 : i32
    return %c0_i32, %c0_i32_0 : i32, i32
  }
  func.func @transform_4(%arg0: i32) -> (i32, i32) {
    %c0_i32 = arith.constant 0 : i32
    %c0_i32_0 = arith.constant 0 : i32
    %c0_i32_1 = arith.constant 0 : i32
    return %c0_i32, %c0_i32_0 : i32, i32
  }
  func.func @transform_5(%arg0: i32) -> (i32, i32) {
    %c0_i32 = arith.constant 0 : i32
    %c0_i32_0 = arith.constant 0 : i32
    %c0_i32_1 = arith.constant 0 : i32
    return %c0_i32, %c0_i32_0 : i32, i32
  }
  func.func @transform_6(%arg0: i32) -> (i32, i32) {
    %c0_i32 = arith.constant 0 : i32
    %c0_i32_0 = arith.constant 0 : i32
    %c0_i32_1 = arith.constant 0 : i32
    return %c0_i32, %c0_i32_0 : i32, i32
  }
  func.func @transform_7(%arg0: i32) -> (i32, i32) {
    %c0_i32 = arith.constant 0 : i32
    %c0_i32_0 = arith.constant 0 : i32
    return %c0_i32, %arg0 : i32, i32
  }
}

</mosaic_0001>

<bundles_post_ra>
// kernel: as_classifier_forward.1
= control target key start
LH: loop header
LB: loop body
LE: loop exit
PB: predicated region body
PF: predicated region fallthrough
CT: control target
= control target key end

     0   :  { %12 = vsyncpa [#allocation4], 0  ;;  %s1087_s0 = inlined_call_operand.vmem [shape: bf16[32,512], index: 0, kind: input, shape index: {}]   ;;  %s1088_s1 = inlined_call_operand.vmem [shape: bf16[28,32], index: 1, kind: input, shape index: {}]   ;;  %s1089_s2 = inlined_call_operand.vmem [shape: f32[28,1], index: 2, kind: input, shape index: {}]   ;;  %s1090_s3 = inlined_call_operand.vmem [shape: bf16[28,28], index: 3, kind: input, shape index: {}]   ;;  %s1091_s4 = inlined_call_operand.vmem [shape: f32[28,1], index: 4, kind: input, shape index: {}]   ;;  %s1092_s5 = inlined_call_operand.vmem [shape: bf16[10,28], index: 5, kind: input, shape index: {}]   ;;  %s1093_s6 = inlined_call_operand.vmem [shape: f32[10,1], index: 6, kind: input, shape index: {}]   ;;  %s1094_s7 = inlined_call_operand.hbm [shape: f32[10,512], index: 7, kind: output, shape index: {}]  }
   0x1   :  { %14 = vsyncpa [#allocation4 + $0x1], 0  ;;  %s918_s24 = smov 0   ;;  %s920_s25 = smov 0  }
   0x2   :  { %s922_s26 = smov 0   ;;  %s924_s27 = smov 0  }
   0x3 LB: > { %s692_s28 = sadd.s32 4294967295, %s872_s27   ;;  %s693_s29 = sadd.s32 4294967294, %s872_s27   ;;  %s872_s27 = sphi %s924_s27, %s1100_s27   ;;  %s868_s26 = sphi %s922_s26, %s1099_s26   ;;  %s864_s25 = sphi %s920_s25, %s1098_s25   ;;  %s860_s24 = sphi %s918_s24, %s1097_s24  }
   0x4   : > { %s941_s30 = sadd.s32 1, %s872_s27   ;;  %s27_s8 = sadd.s32 1, %s868_s26 }
   0x5   : > { %s24_s9 = ssub.s32 %s872_s27, %s941_s30  ;;  %p34_p0 = scmp.ne.s32.totalorder %s868_s26, %s864_s25 }
   0x6   : > { %p25_p1 = scmp.eq.s32.totalorder %s24_s9, 0  ;;  %p35_p2 = scmp.eq.s32.totalorder %s872_s27, 0 }
   0x7   : > { %p190_p3 = scmp.eq.s32.totalorder %s692_s28, 1  ;;  %p195_p4 = scmp.ne.s32.totalorder %s864_s25, %s860_s24 }
   0x8   : > { %s954_s10 = scalar_select %p25_p1, %s868_s26, %s27_s8  }
   0x9   : > { %p36_p5 = por %p35_p2, %p34_p0  ;;  %p956_p6 = por %p190_p3, %p34_p0 }
   0xa   : > { %p196_p7 = scmp.eq.s32.totalorder %s693_s29, 1  ;;  %p695_p9 = scmp.ge.s32.totalorder %s872_s27, 2 }
   0xc   : > { %p960_p8 = por %p196_p7, %p195_p4  ;;  %230 = sbr.rel (%p695_p9) target bundleno = 25 (0x19), region = 40 }
  0x11   : > { %233 = sbr.rel (!%p36_p5) target bundleno = 25 (0x19), region = 44  ;;  %s235_s13 = sand.u32 (%p36_p5), 1, %s868_s26  }
  0x12   : > { %s753_s14 = sshll.u32 (%p36_p5), %s872_s27, 3  ;;  %s696_s15 = sshll.u32 (%p36_p5), %s235_s13, 5 }
  0x13   : > { %s240_s18 = scalar_lea.vmem (%p36_p5), %s1087_s0, %s753_s14  ;;  %s237_s19 = scalar_lea.vmem (%p36_p5), [#allocation2], %s696_s15 }
  0x14   : > { %v275_v0 = vld [vmem:[%s240_s18] sm:$0xff] (%p36_p5)  ;;  %v277_v1 = vld [vmem:[%s240_s18 + $0x10] sm:$0xff] (%p36_p5) }
  0x15   : > { %v279_v2 = vld [vmem:[%s240_s18 + $0x20] sm:$0xff] (%p36_p5)  ;;  %276 = vst [vmem:[%s237_s19] sm:$0xff] (%p36_p5), %v275_v0  ;;  %v281_v3 = vld [vmem:[%s240_s18 + $0x30] sm:$0xff] (%p36_p5) }
  0x16   : > { %278 = vst [vmem:[%s237_s19 + $0x8] sm:$0xff] %v277_v1 }
  0x17   : > { %280 = vst [vmem:[%s237_s19 + $0x10] sm:$0xff] %v279_v2 }
  0x18   : > { %282 = vst [vmem:[%s237_s19 + $0x18] sm:$0xff] %v281_v3 }
  0x19 PF: > { %p699_p10 = scmp.ge.s32.totalorder %s872_s27, 1  ;;  %p287_p11 = scmp.lt.s32.totalorder %s872_s27, 3 }
  0x1b   : > { %p288_p12 = pnand %p699_p10, %p287_p11 }
  0x1c   : > { %s294_s20 = sand.u32 (!%p288_p12), 1, %s864_s25   ;;  %s763_s22 = sshll.u32 (!%p288_p12), %s692_s28, 4 }
  0x1d   : > { %291 = sbr.rel (%p288_p12) target bundleno = 521 (0x209), region = 82  ;;  %s983_s8 = sshll.u32 (!%p288_p12), %s294_s20, 5 }
  0x1e   : > { %s296_s9 = scalar_lea.vmem (!%p288_p12), [#allocation2], %s983_s8  ;;  %s324_s23 = scalar_lea.vmem (!%p288_p12), [#allocation3], %s983_s8 }
  0x1f   : > { %s621_s13 = scalar_lea.hbm (!%p288_p12), %s1094_s7, %s763_s22  ;;  %s622_s14 = sshll.u32 (!%p288_p12), %s324_s23, 4  ;;  %s623_s14 = int_to_ptr.vmem [resolvable:$true] %s622_s14 }
  0x20   : > { %s1054_s15 = sshll.u32 (!%p288_p12), %s621_s13, 4  ;;  %s610_s28 = scalar_lea.sflag (!%p288_p12), [#allocation4], %s294_s20  ;;  %s625_s15 = int_to_ptr.hbm [resolvable:$true] %s1054_s15 }
  0x21   : > { %s824_s8 = sshra.s32 (!%p288_p12), %s625_s15, 4  ;;  %s830_s19 = scalar_lea.hbm (!%p288_p12), %s1094_s7, 64  ;;  %s825_s8 = int_to_ptr.hbm [resolvable:$true] %s824_s8 }
  0x22   : > { %v338_v4 = vld [vmem:[%s1089_s2 + $0x10] sm:$0xff]  ;;  %v336_v5 = vld [vmem:[%s1089_s2] sm:$0xff]  ;;  %v874_v6 = vmov 0   ;;  %v757_v8 = vld [vmem:[%s296_s9 + $0x14] sm:$0xf0]  ;;  %vm390_vm0 = vcmask 261120   ;;  %p831_p2 = scmp.lt.s32.totalorder %s825_s8, %s1094_s7 }
  0x23   : > { %807 = vset.pattern.permute.xlu0 %v874_v6  ;;  %808 = vset.pattern.permute.xlu1 %v874_v6  ;;  %v720_v7 = vld [vmem:[%s296_s9 + $0x10] sm:$0xf]  ;;  %v756_v9 = vld [vmem:[%s296_s9 + $0x14] sm:$0xf]  ;;  %v722_v11 = vld [vmem:[%s296_s9 + $0x18] sm:$0xf0] }
  0x24   : > { %352 = vperm.xlu0 %807, %v338_v4   ;;  %342 = vperm.xlu1 %808, %v336_v5   ;;  %v721_v10 = vor.u32 %v757_v8, %v720_v7  ;;  %v712_v12 = vld [vmem:[%s296_s9] sm:$0xf]  ;;  %v755_v13 = vld [vmem:[%s296_s9 + $0x4] sm:$0xf0]  ;;  %v725_v14 = vor.u32 %v756_v9, %v722_v11  ;;  %v754_v15 = vld [vmem:[%s296_s9 + $0x4] sm:$0xf] }
  0x25   : > { %809 = vset.pattern.permute.xlu2 %v874_v6  ;;  %v714_v16 = vld [vmem:[%s296_s9 + $0x8] sm:$0xf0]  ;;  %v713_v17 = vor.u32 %v755_v13, %v712_v12  ;;  %v339_v19 = vld [vmem:[%s1089_s2 + $0x18] sm:$0xf]  ;;  %v758_v21 = vld [vmem:[%s1088_s1] sm:$0xff]  ;;  %vm492_vm1 = vcmask 1045504  }
  0x26   : > { %403 = vmatpush.bf16.msra.mxu0 %v721_v10  ;;  %422 = vmatpush.bf16.msra.mxu1 %v725_v14  ;;  %v717_v18 = vor.u32 %v754_v15, %v714_v16  ;;  %v337_v20 = vld [vmem:[%s1089_s2 + $0x8] sm:$0xff]  ;;  %v451_v22 = vld [vmem:[%s1091_s4] sm:$0xff]  ;;  %v453_v41 = vld [vmem:[%s1091_s4 + $0x10] sm:$0xff]  ;;  %vm485_vm2 = vcmask 228352   ;;  %s826_s16 = scalar_lea.hbm %s825_s8, 32 }
  0x27   : > { %v452_v23 = vld [vmem:[%s1091_s4 + $0x8] sm:$0xff]  ;;  %467 = vperm.xlu2 %809, %v453_v41   ;;  %v454_v56 = vld [vmem:[%s1091_s4 + $0x18] sm:$0xf]  ;;  %v760_v0 = vld [vmem:[%s1090_s3] sm:$0xff]  ;;  %p827_p13 = scmp.ne.s32.totalorder %s825_s8, %s826_s16  ;;  %p832_p3 = scmp.lt.s32.totalorder %s830_s19, %s826_s16 }
  0x28   : > { %v708_v24 = vld [vmem:[%s1088_s1 + $0x8] sm:$0xf]  ;;  %v759_v25 = vld [vmem:[%s1088_s1 + $0x8] sm:$0x30]  ;;  %v551_v1 = vld [vmem:[%s1093_s6] sm:$0xff] }
  0x29   : > { %v552_v26 = vld [vmem:[%s1093_s6 + $0x8] sm:$0x3]  ;;  %v709_v27 = vor.u32 %v759_v25, %v708_v24  ;;  %v761_v3 = vld [vmem:[%s1090_s3 + $0x8] sm:$0x30]  ;;  %p828_p0 = pnand %p827_p13, %p956_p6  ;;  %p833_p4 = por %p832_p3, %p831_p2 }
  0x2a   : > { %404 = vmatpush.bf16.msra.mxu0 %v713_v17  ;;  %423 = vmatpush.bf16.msra.mxu1 %v717_v18  ;;  %v736_v2 = vld [vmem:[%s1090_s3 + $0x8] sm:$0xf] }
  0x2b   : > { %v737_v4 = vor.u32 %v761_v3, %v736_v2  ;;  %p829_p1 = pneg %p828_p0 }
  0x2c   : > { %357 = vperm.xlu0 %807, %v339_v19   ;;  %347 = vperm.xlu1 %808, %v337_v20  }
  0x2d   : > { %726 = vmatmul.msk.bf16.vlgmr.msra.gmra.mxu0 %vm390_vm0, %v758_v21  ;;  %728 = vmatmul.msk.bf16.vlgmr.msra.gmra.mxu1 %vm390_vm0, %v758_v21  ;;  %p834_p5 = pnand %p833_p4, %p829_p1 }
  0x2f   : > { %472 = vperm.xlu2 %809, %v454_v56  }
  0x34   : > { %457 = vperm.xlu0 %807, %v451_v22   ;;  %462 = vperm.xlu1 %808, %v452_v23  }
  0x37   : > { %555 = vperm.xlu2 %809, %v551_v1  }
  0x3c   : > { %560 = vperm.xlu0 %807, %v552_v26  }
  0x3d   : > { %727 = vmatmul.msk.bf16.gmra.mxu0 %vm390_vm0, %v709_v27  ;;  %729 = vmatmul.msk.bf16.gmra.mxu1 %vm390_vm0, %v709_v27 }
  0x81   : > { %v468_v9 = vpop.permute.xlu2 %467 }
  0x89   : > { %v473_v13 = vpop.permute.xlu2 %472 }
  0x96   : > { %v343_v32 = vpop.permute.xlu1 %342  ;;  %v353_v33 = vpop.permute.xlu0 %352 }
  0x9e   : > { %v348_v36 = vpop.permute.xlu1 %347  ;;  %v358_v38 = vpop.permute.xlu0 %357 }
  0xa6   : > { %v463_v16 = vpop.permute.xlu1 %462  ;;  %v458_v21 = vpop.permute.xlu0 %457 }
  0xaa   : > { %v406_v28 = vpop.f32.mrf.mxu0  ;;  %v425_v29 = vpop.f32.mrf.mxu1 }
  0xab   : > { %v407_v49 = vadd.f32 %v406_v28, %v343_v32  ;;  %v426_v52 = vadd.f32 %v425_v29, %v343_v32 }
  0xad   : > { %v435_v59 = vmax.f32 %v407_v49, 0.0  ;;  %v436_v61 = vmax.f32 %v426_v52, 0.0 }
  0xb2   : > { %v408_v30 = vpop.f32.mrf.mxu0  ;;  %v427_v31 = vpop.f32.mrf.mxu1 }
  0xb3   : > { %v409_v44 = vadd.f32 %v408_v30, %v348_v36  ;;  %v428_v46 = vadd.f32 %v427_v31, %v348_v36  ;;  %v744_v36 = vld [vmem:[%s1092_s5] sm:$0xf] }
  0xb5   : > { %v437_v54 = vmax.f32 %v409_v44, 0.0  ;;  %v438_v57 = vmax.f32 %v428_v46, 0.0 }
  0xb7   : > { %v447_v62 = vpack.c.bf16 %v437_v54, %v435_v59  ;;  %v448_v63 = vpack.c.bf16 %v438_v57, %v436_v61 }
  0xba   : > { %v411_v34 = vpop.f32.mrf.mxu0  ;;  %v430_v35 = vpop.f32.mrf.mxu1 }
  0xbb   : > { %v412_v37 = vadd.f32 %v411_v34, %v353_v33  ;;  %v431_v39 = vadd.f32 %v430_v35, %v353_v33 }
  0xbd   : > { %v439_v47 = vmax.f32 %v412_v37, 0.0  ;;  %v440_v50 = vmax.f32 %v431_v39, 0.0  ;;  %v762_v37 = vld [vmem:[%s1092_s5] sm:$0x10] }
  0xbe   : > { %v745_v41 = vor.u32 %v762_v37, %v744_v36 }
  0xc2   : > { %v413_v40 = vpop.f32.mrf.mxu0  ;;  %v432_v43 = vpop.f32.mrf.mxu1 }
  0xc3   : > { %v414_v42 = vadd.f32 %v413_v40, %v358_v38  ;;  %v433_v45 = vadd.f32 %v432_v43, %v358_v38 }
  0xc5   : > { %v441_v48 = vmax.f32 %v414_v42, 0.0  ;;  %v442_v51 = vmax.f32 %v433_v45, 0.0  ;;  %v556_v42 = vpop.permute.xlu2 %555 }
  0xc7   : > { %v449_v53 = vpack.c.bf16 %v441_v48, %v439_v47  ;;  %v450_v55 = vpack.c.bf16 %v442_v51, %v440_v50  ;;  %v561_v47 = vpop.permute.xlu0 %560 }
  0xc9   : > { %v494_v58 = vsel %vm492_vm1, %v449_v53, 0  ;;  %v497_v60 = vsel %vm492_vm1, %v450_v55, 0 }
  0xca   : > { %505 = vmatpush.bf16.msra.mxu2 %v494_v58  ;;  %524 = vmatpush.bf16.msra.mxu3 %v497_v60 }
  0xce   : > { %506 = vmatpush.bf16.msra.mxu2 %v447_v62  ;;  %525 = vmatpush.bf16.msra.mxu3 %v448_v63 }
  0xd1   : > { %738 = vmatmul.msk.bf16.vlgmr.msra.gmra.mxu2 %vm485_vm2, %v760_v0  ;;  %740 = vmatmul.msk.bf16.vlgmr.msra.gmra.mxu3 %vm485_vm2, %v760_v0 }
  0xe1   : > { %739 = vmatmul.msk.bf16.gmra.mxu2 %vm485_vm2, %v737_v4  ;;  %741 = vmatmul.msk.bf16.gmra.mxu3 %vm485_vm2, %v737_v4 }
 0x154   : > { %v508_v5 = vpop.f32.mrf.mxu2  ;;  %v527_v6 = vpop.f32.mrf.mxu3 }
 0x155   : > { %v509_v25 = vadd.f32 %v508_v5, %v458_v21  ;;  %v528_v28 = vadd.f32 %v527_v6, %v458_v21 }
 0x157   : > { %v537_v34 = vmax.f32 %v509_v25, 0.0  ;;  %v538_v38 = vmax.f32 %v528_v28, 0.0 }
 0x15c   : > { %v510_v7 = vpop.f32.mrf.mxu2  ;;  %v529_v8 = vpop.f32.mrf.mxu3 }
 0x15d   : > { %v511_v19 = vadd.f32 %v510_v7, %v463_v16  ;;  %v530_v22 = vadd.f32 %v529_v8, %v463_v16 }
 0x15f   : > { %v539_v30 = vmax.f32 %v511_v19, 0.0  ;;  %v540_v32 = vmax.f32 %v530_v22, 0.0 }
 0x161   : > { %v547_v39 = vpack.c.bf16 %v539_v30, %v537_v34  ;;  %v548_v40 = vpack.c.bf16 %v540_v32, %v538_v38 }
 0x164   : > { %v513_v10 = vpop.f32.mrf.mxu2  ;;  %v532_v11 = vpop.f32.mrf.mxu3 }
 0x165   : > { %v514_v12 = vadd.f32 %v513_v10, %v468_v9  ;;  %v533_v14 = vadd.f32 %v532_v11, %v468_v9 }
 0x167   : > { %v541_v23 = vmax.f32 %v514_v12, 0.0  ;;  %v542_v26 = vmax.f32 %v533_v14, 0.0 }
 0x16c   : > { %v515_v15 = vpop.f32.mrf.mxu2  ;;  %v534_v18 = vpop.f32.mrf.mxu3 }
 0x16d   : > { %v516_v17 = vadd.f32 %v515_v15, %v473_v13  ;;  %v535_v20 = vadd.f32 %v534_v18, %v473_v13 }
 0x16f   : > { %v543_v24 = vmax.f32 %v516_v17, 0.0  ;;  %v544_v27 = vmax.f32 %v535_v20, 0.0 }
 0x171   : > { %v549_v29 = vpack.c.bf16 %v543_v24, %v541_v23  ;;  %v550_v31 = vpack.c.bf16 %v544_v27, %v542_v26 }
 0x173   : > { %v572_v33 = vsel %vm492_vm1, %v549_v29, 0  ;;  %v575_v35 = vsel %vm492_vm1, %v550_v31, 0 }
 0x174   : > { %583 = vmatpush.bf16.msrb.mxu0 %v572_v33  ;;  %597 = vmatpush.bf16.msrb.mxu1 %v575_v35 }
 0x178   : > { %584 = vmatpush.bf16.msrb.mxu0 %v547_v39  ;;  %598 = vmatpush.bf16.msrb.mxu1 %v548_v40 }
 0x17b   : > { %746 = vmatmul.msk.bf16.vlgmr.msrb.gmra.mxu0 %vm485_vm2, %v745_v41  ;;  %747 = vmatmul.msk.bf16.vlgmr.msrb.gmra.mxu1 %vm485_vm2, %v745_v41 }
 0x1f8   : > { %v586_v43 = vpop.f32.mrf.mxu0  ;;  %v600_v45 = vpop.f32.mrf.mxu1 }
 0x1f9   : > { %v587_v44 = vadd.f32 %v586_v43, %v556_v42  ;;  %v601_v46 = vadd.f32 %v600_v45, %v556_v42 }
 0x1fb   : > { %605 = vst [vmem:[%s324_s23] sm:$0xff] %v587_v44 }
 0x1fc   : > { %606 = vst [vmem:[%s324_s23 + $0x8] sm:$0xff] %v601_v46 }
 0x200   : > { %v588_v48 = vpop.f32.mrf.mxu0  ;;  %v602_v50 = vpop.f32.mrf.mxu1 }
 0x201   : > { %v589_v49 = vadd.f32 %v588_v48, %v561_v47  ;;  %v603_v51 = vadd.f32 %v602_v50, %v561_v47 }
 0x203   : > { %607 = vst [vmem:[%s324_s23 + $0x10] sm:$0x3] %v589_v49 }
 0x204   : > { %608 = vst [vmem:[%s324_s23 + $0x18] sm:$0x3] %v603_v51 }
 0x205   : > { %837 = shalt.err (!%p834_p5)
}
 0x206   : > { %s875_s20 = smov 256   ;;  %s876_s23 = smov 512  }
 0x207   : > { %s877_s29 = smov 16  }
 0x208   : > { %764 = dma.vmem_to_hbm [thread:$0]  (%p956_p6), %s623_s14, 512, %s625_s15, %s610_s28, %s875_s20, %s876_s23, %s877_s29  }
 0x209 PF: > { %s639_s9 = sand.u32 1, %s860_s24   ;;  %p767_p7 = pnand %p695_p9, %p960_p8 }
 0x20a   : > { %s640_s13 = scalar_lea.sflag [#allocation4], %s639_s9 }
 0x20b   : > { %p768_p10 = pneg %p767_p7 }
 0x20d   : > { %855 = dma.done.wait (%p768_p10), %s640_s13, 512  }
 0x20e   : > { %857 = vsyncadd (%p768_p10), %s640_s13, 4294966784  ;;  %p17_p11 = scmp.ge.s32.totalorder %s941_s30, 4   ;;  %s1097_s24 = smov %s864_s25 }
 0x20f   : > { %s1098_s25 = smov %s868_s26  ;;  %s1099_s26 = smov %s954_s10 }
 0x210   : > { %s1100_s27 = smov %s941_s30  ;;  %19 = sbr.rel (!%p17_p11) target bundleno = 3 (0x3), region = 126 }
 0x215   :  { %646 = vsyncpa [#allocation4], 1 }
 0x216   :  { %648 = vsyncpa [#allocation4 + $0x1], 1 }

</bundles_post_ra>
